<compile_context>
chip_gen: v6e
topology: v6e:2x2x1
jax: 0.10.0
libtpu: 0.0.40
codegen_flags: <defaults>
</compile_context>

<pallas_src>
import jax
import jax.numpy as jnp
from jax import lax
from jax.experimental import pallas as pl
from jax.experimental.pallas import tpu as pltpu

_EPS = 1e-8        # torch.nn.CosineSimilarity default eps
_SQRT_EPS = 1e-4   # sqrt(_EPS): per-vector norm clamp (see note in similarity())


def _round_up(n, m):
    return (n + m - 1) // m * m


def _similarity_kernel(x_ref, y_ref, ixn_ref, iyn_ref, o_ref):
    # Pairwise dot products on the MXU: contract the shared last (lane) dim of
    # both operands ('md,nd->mn') — no in-kernel transpose, f32 accumulation.
    dots = lax.dot_general(
        x_ref[...], y_ref[...],
        dimension_numbers=(((1,), (1,)), ((), ())),
        preferred_element_type=jnp.float32)                    # (TM, TN) f32

    # Inverse norms arrive pre-clamped with 1/temp folded in:
    #   ixn: (TM, 1), iyn: (1, TN)  ->  two broadcast VPU multiplies + cast.
    o_ref[...] = (dots * ixn_ref[...] * iyn_ref[...]).astype(o_ref.dtype)


def similarity(x, y, temp, *, tm=512, tn=256, matmul_dtype=None, out_dtype=None):
    """Pallas implementation of Similarity.forward for the SimCSE pattern.

    Accepts x: (B, 1, H), y: (1, By, H) -> (B, By) pairwise cosine/temp,
    or plain 2-D x: (B, H), y: (By, H).

    matmul_dtype: optional dtype for the MXU operands (e.g. jnp.bfloat16 on
    v6e for ~2-4x throughput); accumulation and normalization stay in f32.
    """
    x2d = jnp.squeeze(x, axis=1) if x.ndim == 3 else x   # (B, H)
    y2d = jnp.squeeze(y, axis=0) if y.ndim == 3 else y   # (By, H)

    B, H = x2d.shape
    By, Hy = y2d.shape
    assert H == Hy, "hidden dims must match"

    if out_dtype is None:
        out_dtype = x2d.dtype
    mm_dtype = x2d.dtype if matmul_dtype is None else jnp.dtype(matmul_dtype)

    # ---- Row L2 norms, computed ONCE on the unpadded operands (f32). ----
    # torch does dot / max(||x||*||y||, eps) / temp.  Clamping each norm at
    # sqrt(eps) instead of clamping the product differs only for near-zero
    # embeddings, and lets eps + 1/temp fold into O(B)+O(By) vectors so the
    # per-tile epilogue is just two multiplies.
    xn = jnp.sqrt(jnp.sum(x2d.astype(jnp.float32) ** 2, axis=-1, keepdims=True))
    yn = jnp.sqrt(jnp.sum(y2d.astype(jnp.float32) ** 2, axis=-1, keepdims=True))
    ixn = 1.0 / jnp.maximum(xn, _SQRT_EPS)                         # (B, 1)
    iyn = 1.0 / (jnp.maximum(yn, _SQRT_EPS) * jnp.float32(temp))   # (By, 1)

    # ---- Tile selection: big resident x tile, 256-wide lane-dense out. ----
    TM = min(tm, _round_up(B, 8))       # sublane multiple
    TN = min(tn, _round_up(By, 128))    # lane-dense output stores
    Hp = _round_up(H, 128)
    in_bytes = jnp.dtype(mm_dtype).itemsize
    out_bytes = jnp.dtype(out_dtype).itemsize

    def vmem_estimate(tm_, tn_):
        # double-buffered x, y and output blocks (+ tiny norm blocks)
        return (2 * (tm_ + tn_) * Hp * in_bytes
                + 2 * tm_ * tn_ * out_bytes
                + 4 * (tm_ + tn_) * 4)

    budget = 44 << 20   # leaves headroom even inside v7x's 64 MiB physical VMEM
    while vmem_estimate(TM, TN) > budget and TM > 256:
        TM = max(256, _round_up(TM // 2, 8))
    while vmem_estimate(TM, TN) > budget and TN > 128:
        TN = max(128, _round_up(TN // 2, 128))
    # TODO(synk): for very large H (f32, H >= ~16K) even the minimum tiles can
    # exceed the budget; add a K grid axis ('arbitrary') with an f32 VMEM
    # accumulator to bound per-tile VMEM regardless of H.

    Mp = _round_up(B, TM)
    Np = _round_up(By, TN)

    # ---- Pad only when needed (skip copies for aligned shapes). ----
    x_mm = x2d.astype(mm_dtype)
    y_mm = y2d.astype(mm_dtype)
    xp = x_mm if (Mp, Hp) == (B, H) else jnp.pad(x_mm, ((0, Mp - B), (0, Hp - H)))
    yp = y_mm if (Np, Hp) == (By, H) else jnp.pad(y_mm, ((0, Np - By), (0, Hp - H)))
    ixp = ixn if Mp == B else jnp.pad(ixn, ((0, Mp - B), (0, 0)))
    iyp = iyn if Np == By else jnp.pad(iyn, ((0, Np - By), (0, 0)))
    iyp = iyp.reshape(1, Np)            # (1, Np): no in-kernel transpose

    vmem_limit = int(min(56 << 20, max(32 << 20, vmem_estimate(TM, TN) + (8 << 20))))

    out = pl.pallas_call(
        _similarity_kernel,
        out_shape=jax.ShapeDtypeStruct((Mp, Np), out_dtype),
        grid_spec=pltpu.PrefetchScalarGridSpec(
            num_scalar_prefetch=0,
            # i outer (x resident), j inner (y streams); both axes parallel so
            # v7x's two TensorCores can shard whenever either axis has >= 2 blocks.
            grid=(Mp // TM, Np // TN),
            in_specs=[
                pl.BlockSpec((TM, Hp), lambda i, j: (i, 0)),   # x rows (resident)
                pl.BlockSpec((TN, Hp), lambda i, j: (j, 0)),   # y rows (streamed)
                pl.BlockSpec((TM, 1), lambda i, j: (i, 0)),    # 1/||x||
                pl.BlockSpec((1, TN), lambda i, j: (0, j)),    # 1/(||y||*temp)
            ],
            out_specs=pl.BlockSpec((TM, TN), lambda i, j: (i, j)),
        ),
        compiler_params=pltpu.CompilerParams(
            dimension_semantics=("parallel", "parallel"),
            vmem_limit_bytes=vmem_limit),
    )(xp, yp, ixp, iyp)

    if (Mp, Np) != (B, By):
        out = out[:B, :By]
    return out


def _reference(x, y, temp):
    """Pure-JAX reference mirroring torch CosineSimilarity(dim=-1) + broadcast."""
    num = jnp.sum(x * y, axis=-1)
    nx = jnp.sqrt(jnp.sum(x * x, axis=-1))
    ny = jnp.sqrt(jnp.sum(y * y, axis=-1))
    return num / jnp.maximum(nx * ny, _EPS) / temp


if __name__ == "__main__":
    key = jax.random.PRNGKey(0)
    kx, ky = jax.random.split(key)

    B, H = 8, 32
    temp = 0.05  # SimCSE default temperature

    # SimCSE-style broadcast inputs: (B, 1, H) vs (1, B, H) -> (B, B)
    x = jax.random.normal(kx, (B, 1, H), dtype=jnp.float32)
    y = jax.random.normal(ky, (1, B, H), dtype=jnp.float32)

    out = jax.block_until_ready(similarity(x, y, temp))

    ref = _reference(x, y, temp)
    assert out.shape == (B, B)
    max_err = jnp.max(jnp.abs(out - ref))
    assert jnp.allclose(out, ref, atol=2e-4, rtol=2e-4), f"max abs err {max_err}"

    print("KERNEL_OK")
</pallas_src>

<mosaic_0001>
module attributes {stable_mosaic.version = 11 : i64} {
  func.func @_similarity_kernel(%arg0: i32, %arg1: i32, %arg2: memref<8x128xf32, #tpu.memory_space<vmem>>, %arg3: memref<128x128xf32, #tpu.memory_space<vmem>>, %arg4: memref<8x1xf32, #tpu.memory_space<vmem>>, %arg5: memref<1x128xf32, #tpu.memory_space<vmem>>, %arg6: memref<8x128xf32, #tpu.memory_space<vmem>>) attributes {dimension_semantics = [#tpu.dimension_semantics<parallel>, #tpu.dimension_semantics<parallel>], iteration_bounds = array<i64: 1, 1>, scalar_prefetch = 0 : i64, scratch_operands = 0 : i64, tpu.core_type = #tpu.core_type<tc>, window_params = [{transform_indices = @transform_0, window_bounds = array<i64: 8, 128>}, {transform_indices = @transform_1, window_bounds = array<i64: 128, 128>}, {transform_indices = @transform_2, window_bounds = array<i64: 8, 1>}, {transform_indices = @transform_3, window_bounds = array<i64: 1, 128>}, {transform_indices = @transform_4, window_bounds = array<i64: 8, 128>}]} {
    %c0 = arith.constant 0 : index
    %c0_0 = arith.constant 0 : index
    %0 = vector.load %arg2[%c0, %c0_0] : memref<8x128xf32, #tpu.memory_space<vmem>>, vector<8x128xf32>
    %c0_1 = arith.constant 0 : index
    %c0_2 = arith.constant 0 : index
    %1 = vector.load %arg3[%c0_1, %c0_2] : memref<128x128xf32, #tpu.memory_space<vmem>>, vector<128x128xf32>
    %cst = arith.constant dense<0.000000e+00> : vector<8x128xf32>
    %2 = tpu.matmul %0, %1, %cst {dimension_numbers = #tpu.dot_dimension_numbers<[1], [1], [0], [0], [0, 0, 1, 0], [], []>} : vector<8x128xf32>, vector<128x128xf32>, vector<8x128xf32> -> vector<8x128xf32>
    %c0_3 = arith.constant 0 : index
    %c0_4 = arith.constant 0 : index
    %3 = vector.load %arg4[%c0_3, %c0_4] : memref<8x1xf32, #tpu.memory_space<vmem>>, vector<8x1xf32>
    %4 = vector.broadcast %3 : vector<8x1xf32> to vector<8x128xf32>
    %5 = arith.mulf %2, %4 : vector<8x128xf32>
    %c0_5 = arith.constant 0 : index
    %c0_6 = arith.constant 0 : index
    %6 = vector.load %arg5[%c0_5, %c0_6] : memref<1x128xf32, #tpu.memory_space<vmem>>, vector<1x128xf32>
    %7 = vector.broadcast %6 : vector<1x128xf32> to vector<8x128xf32>
    %8 = arith.mulf %5, %7 : vector<8x128xf32>
    %c0_7 = arith.constant 0 : index
    %c0_8 = arith.constant 0 : index
    %9 = vector.load %arg6[%c0_7, %c0_8] : memref<8x128xf32, #tpu.memory_space<vmem>>, vector<8x128xf32>
    tpu.vector_store %arg6[%c0_7, %c0_8], %8 {strides = array<i32>} : memref<8x128xf32, #tpu.memory_space<vmem>>, vector<8x128xf32>,
    return
  }
  func.func @transform_0(%arg0: i32, %arg1: i32) -> (i32, i32) {
    %c0_i32 = arith.constant 0 : i32
    %c0_i32_0 = arith.constant 0 : i32
    return %arg0, %c0_i32 : i32, i32
  }
  func.func @transform_1(%arg0: i32, %arg1: i32) -> (i32, i32) {
    %c0_i32 = arith.constant 0 : i32
    %c0_i32_0 = arith.constant 0 : i32
    return %arg1, %c0_i32 : i32, i32
  }
  func.func @transform_2(%arg0: i32, %arg1: i32) -> (i32, i32) {
    %c0_i32 = arith.constant 0 : i32
    %c0_i32_0 = arith.constant 0 : i32
    return %arg0, %c0_i32 : i32, i32
  }
  func.func @transform_3(%arg0: i32, %arg1: i32) -> (i32, i32) {
    %c0_i32 = arith.constant 0 : i32
    %c0_i32_0 = arith.constant 0 : i32
    return %c0_i32, %arg1 : i32, i32
  }
  func.func @transform_4(%arg0: i32, %arg1: i32) -> (i32, i32) {
    %c0_i32 = arith.constant 0 : i32
    return %arg0, %arg1 : i32, i32
  }
}

</mosaic_0001>

<bundles_post_ra>
// kernel: tpu_custom_call.1
= control target key start
LH: loop header
LB: loop body
LE: loop exit
PB: predicated region body
PF: predicated region fallthrough
CT: control target
= control target key end

     0   :  { %9 = vsyncpa [#allocation3], 0  ;;  %s302_s0 = inlined_call_operand.vmem [shape: f32[8,128], index: 0, kind: input, shape index: {}]   ;;  %s303_s1 = inlined_call_operand.hbm [shape: f32[128,128], index: 1, kind: input, shape index: {}]   ;;  %s304_s2 = inlined_call_operand.vmem [shape: f32[8,1], index: 2, kind: input, shape index: {}]   ;;  %s305_s3 = inlined_call_operand.vmem [shape: f32[1,128], index: 3, kind: input, shape index: {}]   ;;  %s306_s4 = inlined_call_operand.hbm [shape: f32[8,128], index: 4, kind: output, shape index: {}]  }
   0x1   :  { %10 = vsyncpa [#allocation4], 0  ;;  %s255_s15 = smov [#allocation2]  }
   0x2   :  { %s18_s16 = sshll.u32 %s255_s15, 4  ;;  %s19_s16 = int_to_ptr.vmem [resolvable:$true] %s18_s16 }
   0x3   :  { %s219_s17 = scalar_lea.vmem %s19_s16, 2048  ;;  %p224_p1 = scmp.lt.s32.totalorder %s19_s16, %s19_s16 }
   0x4   :  { %p220_p0 = scmp.ne.s32.totalorder %s19_s16, %s219_s17  ;;  %p225_p2 = scmp.lt.s32.totalorder %s219_s17, %s219_s17 }
   0x6   :  { %p226_p3 = por %p225_p2, %p224_p1 }
   0x8   :  { %p227_p4 = pnand %p226_p3, %p220_p0 }
   0xa   :  { %230 = shalt.err (!%p227_p4)
}
   0xb   :  { %s256_s18 = smov 128   ;;  %s257_s19 = smov 8  }
   0xc   :  { %24 = dma.hbm_to_vmem [thread:$0]  %s303_s1, 2048, %s19_s16, [#allocation3], %s256_s18, %s256_s18, %s257_s19  }
   0xd   :  { %251 = dma.done.wait [#allocation3], 2048  }
   0xe   :  { %252 = vsyncadd [#allocation3], 4294965248  ;;  %v258_v0 = vmov 0.0   ;;  %vm259_vm0 = vmmov 0   ;;  %v260_v1 = vmov 0   ;;  %v48_v2 = vld [vmem:[#allocation2 + $0x78] sm:$0xff] }
   0xf   :  { %168 = vmatprep.subr.mxu0 %v258_v0  ;;  %200 = vmatprep.mubr.msk.f32.mxu0 %vm259_vm0, %v258_v0  ;;  %v47_v3 = vld [vmem:[#allocation2 + $0x70] sm:$0xff]  ;;  %v119_v4 = vld [vmem:[%s304_s2] sm:$0xff]  ;;  %v46_v5 = vld [vmem:[#allocation2 + $0x68] sm:$0xff]  ;;  %s261_s26 = smov [#allocation5]  }
  0x10   :  { %210 = vset.pattern.permute.xlu0 %v260_v1  ;;  %169 = vmatpush3.xpose.msra.mxu0 %v48_v2  ;;  %v45_v6 = vld [vmem:[#allocation2 + $0x60] sm:$0xff]  ;;  %v44_v7 = vld [vmem:[#allocation2 + $0x58] sm:$0xff]  ;;  %v43_v8 = vld [vmem:[#allocation2 + $0x50] sm:$0xff]  ;;  %s141_s27 = sshll.u32 %s261_s26, 4  ;;  %s142_s27 = int_to_ptr.vmem [resolvable:$true] %s141_s27 }
  0x11   :  { %170 = vmatprep.subr.mxu0 %v258_v0  ;;  %122 = vperm.xlu0 %210, %v119_v4   ;;  %v42_v9 = vld [vmem:[#allocation2 + $0x48] sm:$0xff]  ;;  %v41_v10 = vld [vmem:[#allocation2 + $0x40] sm:$0xff]  ;;  %v40_v11 = vld [vmem:[#allocation2 + $0x38] sm:$0xff]  ;;  %s231_s28 = scalar_lea.vmem %s142_s27, 128  ;;  %p236_p6 = scmp.lt.s32.totalorder %s142_s27, %s142_s27 }
  0x12   :  { %v39_v12 = vld [vmem:[#allocation2 + $0x30] sm:$0xff]  ;;  %v38_v13 = vld [vmem:[#allocation2 + $0x28] sm:$0xff]  ;;  %v37_v14 = vld [vmem:[#allocation2 + $0x20] sm:$0xff]  ;;  %p232_p5 = scmp.ne.s32.totalorder %s142_s27, %s231_s28  ;;  %p237_p7 = scmp.lt.s32.totalorder %s231_s28, %s231_s28 }
  0x13   :  { %v36_v15 = vld [vmem:[#allocation2 + $0x18] sm:$0xff]  ;;  %v35_v16 = vld [vmem:[#allocation2 + $0x10] sm:$0xff]  ;;  %v34_v17 = vld [vmem:[#allocation2 + $0x8] sm:$0xff] }
  0x14   :  { %171 = vmatpush3.xpose.msra.mxu0 %v47_v3  ;;  %v33_v18 = vld [vmem:[#allocation2] sm:$0xff]  ;;  %p238_p8 = por %p237_p7, %p236_p6 }
  0x15   :  { %172 = vmatprep.subr.mxu0 %v258_v0  ;;  %v32_v19 = vld [vmem:[%s302_s0] sm:$0xff] }
  0x16   :  { %v150_v22 = vld [vmem:[%s305_s3] ss:$0 sm:$0xff]  ;;  %p239_p9 = pnand %p238_p8, %p232_p5 }
  0x18   :  { %173 = vmatpush3.xpose.msra.mxu0 %v46_v5 }
  0x19   :  { %174 = vmatprep.subr.mxu0 %v258_v0 }
  0x1c   :  { %175 = vmatpush3.xpose.msra.mxu0 %v45_v6 }
  0x1d   :  { %176 = vmatprep.subr.mxu0 %v258_v0 }
  0x20   :  { %177 = vmatpush3.xpose.msra.mxu0 %v44_v7 }
  0x21   :  { %178 = vmatprep.subr.mxu0 %v258_v0 }
  0x24   :  { %179 = vmatpush3.xpose.msra.mxu0 %v43_v8 }
  0x25   :  { %180 = vmatprep.subr.mxu0 %v258_v0 }
  0x28   :  { %181 = vmatpush3.xpose.msra.mxu0 %v42_v9 }
  0x29   :  { %182 = vmatprep.subr.mxu0 %v258_v0 }
  0x2c   :  { %183 = vmatpush3.xpose.msra.mxu0 %v41_v10 }
  0x2d   :  { %184 = vmatprep.subr.mxu0 %v258_v0 }
  0x30   :  { %185 = vmatpush3.xpose.msra.mxu0 %v40_v11 }
  0x31   :  { %186 = vmatprep.subr.mxu0 %v258_v0 }
  0x34   :  { %187 = vmatpush3.xpose.msra.mxu0 %v39_v12 }
  0x35   :  { %188 = vmatprep.subr.mxu0 %v258_v0 }
  0x38   :  { %189 = vmatpush3.xpose.msra.mxu0 %v38_v13 }
  0x39   :  { %190 = vmatprep.subr.mxu0 %v258_v0 }
  0x3c   :  { %191 = vmatpush3.xpose.msra.mxu0 %v37_v14 }
  0x3d   :  { %192 = vmatprep.subr.mxu0 %v258_v0 }
  0x40   :  { %193 = vmatpush3.xpose.msra.mxu0 %v36_v15 }
  0x41   :  { %194 = vmatprep.subr.mxu0 %v258_v0 }
  0x44   :  { %195 = vmatpush3.xpose.msra.mxu0 %v35_v16 }
  0x45   :  { %196 = vmatprep.subr.mxu0 %v258_v0 }
  0x48   :  { %197 = vmatpush3.xpose.msra.mxu0 %v34_v17 }
  0x49   :  { %198 = vmatprep.subr.mxu0 %v258_v0 }
  0x4c   :  { %199 = vmatpush3.xpose.msra.mxu0 %v33_v18 }
  0x4f   :  { %201 = vmatmul.mubr.f32.vlgmr.msra.gmra.mxu0 %v32_v19 }
  0x8c   :  { %v123_v20 = vpop.permute.xlu0 %122 }
 0x10f   :  { %v115_v21 = vpop.f32.mrf.mxu0 }
 0x110   :  { %v125_v23 = vmul.f32 %v123_v20, %v115_v21 }
 0x111   :  { %v202_v24 = vpop.f32.mrf.mxu0 }
 0x112   :  { %v133_v25 = vmul.f32 %v150_v22, %v125_v23 }
 0x114   :  { %134 = vst [vmem:[#allocation5] sm:$0xff] %v133_v25 }
 0x115   :  { %242 = shalt.err (!%p239_p9)
}
 0x116   :  { %144 = dma.vmem_to_hbm [thread:$0]  %s142_s27, 128, %s306_s4, [#allocation4]  }
 0x117   :  { %253 = dma.done.wait [#allocation4], 128  }
 0x118   :  { %254 = vsyncadd [#allocation4], 4294967168 }
 0x119   :  { %148 = vsyncpa [#allocation3], 1 }
 0x11a   :  { %149 = vsyncpa [#allocation4], 1 }

</bundles_post_ra>
